<compile_context>
chip_gen: v6e
topology: v6e:2x2x1
jax: 0.10.0
libtpu: 0.0.40
codegen_flags: <defaults>
</compile_context>

<pallas_src>
import functools

import jax
import jax.numpy as jnp
from jax.experimental import pallas as pl
from jax.experimental.pallas import tpu as pltpu

BN_EPS = 1e-5
GAMMA = 2.0
IGNORE_INDEX = -100
# Per-tile VMEM at TILE_N=1024 / F_PAD=512 / C_PAD=128 (double-buffered IO plus
# the implicit f32 fc1 intermediate) is only a few MiB -> safe on v5e/v6e/v7x.
# On v5e (single vector-store slot) 512 may be worth re-sweeping; 1024 is the
# portable default (measured ~86% of HBM roofline for mem-bound tilings).
TILE_N_MAX = 1024


def _round_up(x, m):
    return ((x + m - 1) // m) * m


def _cdiv(a, b):
    return -(-a // b)


# ---------------------------------------------------------------------------
# Fused kernel: (BN-folded fc1) -> ReLU -> fc_out -> bf16 logits tile
#               + focal-loss partials (CE sum, valid count) per row tile
# ---------------------------------------------------------------------------
def fused_classifier_loss_kernel(
    x_ref,        # (TILE_N, H)      bf16
    labels_ref,   # (TILE_N, 1)      int32
    w1_ref,       # (H, F_PAD)       bf16   (both BatchNorms folded in)
    b1_ref,       # (1, F_PAD)       f32    (both BatchNorms folded in)
    w2_ref,       # (F_PAD, C_PAD)   bf16
    b2_ref,       # (1, C_PAD)       f32
    logits_ref,   # (TILE_N, C_PAD)  bf16 out (lane-dense, padded classes == 0)
    part_ref,     # (8, 128)         f32  out ([0,0]=ce_sum, [0,1]=valid count)
    *,
    num_labels,
    n_rows,
    tile_n,
):
    # fc1 (BN1/BN2 pre-folded).  K = d_model may be < 128 so the MXU K dim is
    # under-filled for small d_model; acceptable (kernel is HBM/overhead bound).
    h = jnp.dot(x_ref[...], w1_ref[...], preferred_element_type=jnp.float32)
    h = jnp.maximum(h + b1_ref[...], 0.0)          # ReLU; Dropout = identity (eval)

    # fc_out: full 128-wide output tile -> unmasked lane-dense store.
    # bf16 writeback halves the dominant HBM traffic; loss below stays in f32.
    logits = jnp.dot(h.astype(w2_ref.dtype), w2_ref[...],
                     preferred_element_type=jnp.float32) + b2_ref[...]
    logits_ref[...] = logits.astype(logits_ref.dtype)

    # ---- fused focal-loss partial reduction over real classes / real rows ---
    labels = labels_ref[...]                                       # (TILE_N, 1)
    class_ids = jax.lax.broadcasted_iota(jnp.int32, logits.shape, 1)
    real_class = class_ids < num_labels
    masked = jnp.where(real_class, logits, -1e30)                  # exclude pad cols
    m = jnp.max(masked, axis=-1, keepdims=True)
    lse = m + jnp.log(jnp.sum(jnp.exp(masked - m), axis=-1, keepdims=True))
    onehot = (class_ids == labels).astype(jnp.float32)
    picked = jnp.sum(logits * onehot, axis=-1, keepdims=True)

    # No host-side padding: edge-tile rows past n_rows contain garbage, so gate
    # with an explicit row-validity mask and jnp.where (not multiply-by-mask,
    # which would let NaN * 0 poison ce_sum).
    row_ids = (pl.program_id(0) * tile_n
               + jax.lax.broadcasted_iota(jnp.int32, labels.shape, 0))
    valid = (labels != IGNORE_INDEX) & (row_ids < n_rows)
    ce_sum = jnp.sum(jnp.where(valid, lse - picked, 0.0), axis=0, keepdims=True)
    cnt = jnp.sum(jnp.where(valid, 1.0, 0.0), axis=0, keepdims=True)

    # Per-tile partials in the minimal (8,128) f32 VMEM block: 4 KiB/step,
    # <2% of the logits store.  (Kept in VMEM rather than a blocked-SMEM scalar
    # output for lowering robustness.)
    rows = jax.lax.broadcasted_iota(jnp.int32, part_ref.shape, 0)
    cols = jax.lax.broadcasted_iota(jnp.int32, part_ref.shape, 1)
    part = jnp.where((rows == 0) & (cols == 0), ce_sum, 0.0)
    part = part + jnp.where((rows == 0) & (cols == 1), cnt, 0.0)
    part_ref[...] = part


def run_classifier_and_loss(x2d, labels1d, fw, *, num_labels):
    n, h_dim = x2d.shape
    f_pad = fw["w1"].shape[1]
    c_pad = fw["w2"].shape[1]

    # Fat row tiles (amortize ~0.35 us/grid-step overhead), but capped at
    # ceil(n/2) so grid_n >= 2 whenever possible -> both v7x TensorCores work.
    tile_n = min(TILE_N_MAX, _round_up(max((n + 1) // 2, 1), 8))
    grid_n = _cdiv(n, tile_n)

    x_bf16 = x2d.astype(jnp.bfloat16)                # no-op: already bf16
    labels2d = labels1d.reshape(-1, 1).astype(jnp.int32)

    cost = pl.CostEstimate(
        flops=2 * grid_n * tile_n * (h_dim * f_pad + f_pad * c_pad),
        transcendentals=grid_n * tile_n * (c_pad + 1),
        bytes_accessed=(n * h_dim * 2 + n * 4 + n * c_pad * 2
                        + h_dim * f_pad * 2 + f_pad * c_pad * 2
                        + (f_pad + c_pad) * 4 + grid_n * 8 * 128 * 4),
    )

    kernel = functools.partial(fused_classifier_loss_kernel,
                               num_labels=num_labels, n_rows=n, tile_n=tile_n)
    logits_bf16, partials = pl.pallas_call(
        kernel,
        out_shape=(
            jax.ShapeDtypeStruct((n, c_pad), jnp.bfloat16),
            jax.ShapeDtypeStruct((grid_n * 8, 128), jnp.float32),
        ),
        grid=(grid_n,),
        in_specs=[
            pl.BlockSpec((tile_n, h_dim), lambda i: (i, 0)),
            pl.BlockSpec((tile_n, 1), lambda i: (i, 0)),
            # Constant-index weight/bias blocks: fetched once, stay resident.
            pl.BlockSpec((h_dim, f_pad), lambda i: (0, 0)),
            pl.BlockSpec((1, f_pad), lambda i: (0, 0)),
            pl.BlockSpec((f_pad, c_pad), lambda i: (0, 0)),
            pl.BlockSpec((1, c_pad), lambda i: (0, 0)),
        ],
        out_specs=(
            pl.BlockSpec((tile_n, c_pad), lambda i: (i, 0)),
            pl.BlockSpec((8, 128), lambda i: (i, 0)),
        ),
        compiler_params=pltpu.CompilerParams(
            dimension_semantics=("parallel",),   # shard row tiles across v7x's 2 TCs
            vmem_limit_bytes=32 * 1024 * 1024,
        ),
        cost_estimate=cost,
    )(x_bf16, labels2d, fw["w1"], fw["b1"], fw["w2"], fw["b2"])

    # Tiny scalar combine in the wrapper keeps the grid axis "parallel".
    ce_sum = jnp.sum(partials[:, 0])
    cnt = jnp.sum(partials[:, 1])
    ce = ce_sum / jnp.maximum(cnt, 1.0)     # cross_entropy, mean over valid tokens
    pt = jnp.exp(-ce)
    loss = (1.0 - pt) ** GAMMA * ce
    return loss, logits_bf16                # padded bf16 logits (n, C_PAD)


# ---------------------------------------------------------------------------
# Parameter construction (deterministic, in-script) + one-time folding/padding
# ---------------------------------------------------------------------------
def make_params(key, vocab_size, d_model, fc_hidden, num_labels):
    keys = jax.random.split(key, 8)
    p = {}
    # backbone stand-in embedding table
    p["emb"] = jax.random.normal(keys[0], (vocab_size, d_model), jnp.float32) * 0.02
    # BatchNorm1d(d_model): weight=1, bias=0, deterministic-random running stats
    p["bn1_g"] = jnp.ones((d_model,), jnp.float32)
    p["bn1_b"] = jnp.zeros((d_model,), jnp.float32)
    p["bn1_m"] = jax.random.normal(keys[1], (d_model,), jnp.float32) * 0.1
    p["bn1_v"] = jnp.abs(jax.random.normal(keys[2], (d_model,), jnp.float32)) * 0.1 + 1.0
    # fc1: Linear(d_model, fc_hidden)
    p["w1"] = jax.random.normal(keys[3], (d_model, fc_hidden), jnp.float32) / jnp.sqrt(d_model)
    p["b1"] = jnp.zeros((fc_hidden,), jnp.float32)
    # BatchNorm1d(fc_hidden)
    p["bn2_g"] = jnp.ones((fc_hidden,), jnp.float32)
    p["bn2_b"] = jnp.zeros((fc_hidden,), jnp.float32)
    p["bn2_m"] = jax.random.normal(keys[4], (fc_hidden,), jnp.float32) * 0.1
    p["bn2_v"] = jnp.abs(jax.random.normal(keys[5], (fc_hidden,), jnp.float32)) * 0.1 + 1.0
    # fc_out: Linear(fc_hidden, num_labels)
    p["w2"] = jax.random.normal(keys[6], (fc_hidden, num_labels), jnp.float32) / jnp.sqrt(fc_hidden)
    p["b2"] = jnp.zeros((num_labels,), jnp.float32)
    return p


def fold_and_pad(p):
    """One-time constant folding of both eval-mode BatchNorms into fc1 and
    zero-padding of fc_hidden -> mult-of-128 / num_labels -> 128 for the MXU.
    Embedding table is stored in bf16 so the gather emits bf16 directly."""
    d_model, fc_hidden = p["w1"].shape
    num_labels = p["w2"].shape[1]
    f_pad = _round_up(fc_hidden, 128)
    c_pad = _round_up(num_labels, 128)

    s1 = p["bn1_g"] * jax.lax.rsqrt(p["bn1_v"] + BN_EPS)
    c1 = p["bn1_b"] - p["bn1_m"] * s1
    s2 = p["bn2_g"] * jax.lax.rsqrt(p["bn2_v"] + BN_EPS)
    c2 = p["bn2_b"] - p["bn2_m"] * s2

    w1f = (s1[:, None] * p["w1"]) * s2[None, :]          # (H, F)
    b1f = (c1 @ p["w1"] + p["b1"]) * s2 + c2             # (F,)

    # Zero-pad so padded fc1 columns are exactly 0 after ReLU, and padded
    # fc_out columns/rows are exactly 0 -> no leakage into the real logits.
    w1p = jnp.zeros((d_model, f_pad), jnp.float32).at[:, :fc_hidden].set(w1f)
    b1p = jnp.zeros((1, f_pad), jnp.float32).at[0, :fc_hidden].set(b1f)
    w2p = jnp.zeros((f_pad, c_pad), jnp.float32).at[:fc_hidden, :num_labels].set(p["w2"])
    b2p = jnp.zeros((1, c_pad), jnp.float32).at[0, :num_labels].set(p["b2"])

    return {
        "emb": p["emb"].astype(jnp.bfloat16),   # gather+mask already produce bf16
        "w1": w1p.astype(jnp.bfloat16),         # bf16 MXU inputs, f32 accumulation
        "b1": b1p,
        "w2": w2p.astype(jnp.bfloat16),
        "b2": b2p,
    }


# ---------------------------------------------------------------------------
# Full module forward:  (loss, logits) = model(input_ids, attention_mask, labels)
# ---------------------------------------------------------------------------
@functools.partial(jax.jit, static_argnames=("num_labels",))
def lcplm_forward(fw, input_ids, attention_mask, labels, *, num_labels):
    batch, seq_len = input_ids.shape
    # TODO(synk): real LC-PLM (Mamba) backbone not replicated — deterministic
    # bf16 embedding-lookup stand-in producing hidden_states[-1].
    seq_out = fw["emb"][input_ids] * attention_mask[..., None].astype(jnp.bfloat16)
    d_model = seq_out.shape[-1]
    x2d = seq_out.reshape(-1, d_model)                   # (batch*seq_len, d_model)
    labels1d = labels.reshape(-1)
    loss, logits_pad = run_classifier_and_loss(x2d, labels1d, fw, num_labels=num_labels)
    # Single consumer-side pass: column slice of the padded bf16 logits + f32
    # cast + reshape (no row slice needed — the kernel output has exactly n rows).
    logits = logits_pad[:, :num_labels].astype(jnp.float32).reshape(
        batch, seq_len, num_labels)
    return loss, logits


if __name__ == "__main__":
    BATCH, SEQ = 2, 16         # n = 32 rows -> two 16-row tiles (exercises grid_n >= 2)
    D_MODEL = 32
    FC_HIDDEN = 500
    NUM_LABELS = 2
    VOCAB = 20

    key = jax.random.PRNGKey(0)
    kp, ki, kl = jax.random.split(key, 3)

    raw_params = make_params(kp, VOCAB, D_MODEL, FC_HIDDEN, NUM_LABELS)
    fw = fold_and_pad(raw_params)        # one-time, outside the jitted forward

    input_ids = jax.random.randint(ki, (BATCH, SEQ), 0, VOCAB, dtype=jnp.int32)
    attention_mask = jnp.ones((BATCH, SEQ), jnp.int32)
    labels = jax.random.randint(kl, (BATCH, SEQ), 0, NUM_LABELS, dtype=jnp.int32)
    # sprinkle an ignore_index token to exercise masking
    labels = labels.at[0, 0].set(IGNORE_INDEX)

    loss, logits = lcplm_forward(fw, input_ids, attention_mask, labels,
                                 num_labels=NUM_LABELS)
    jax.block_until_ready((loss, logits))

    assert logits.shape == (BATCH, SEQ, NUM_LABELS)
    assert loss.shape == ()
    assert bool(jnp.isfinite(loss))
    print("KERNEL_OK")
</pallas_src>

<mosaic_0001>
module attributes {stable_mosaic.version = 11 : i64} {
  func.func @fused_classifier_loss_kernel(%arg0: i32, %arg1: memref<16x32xbf16, #tpu.memory_space<vmem>>, %arg2: memref<16x1xi32, #tpu.memory_space<vmem>>, %arg3: memref<32x512xbf16, #tpu.memory_space<vmem>>, %arg4: memref<1x512xf32, #tpu.memory_space<vmem>>, %arg5: memref<512x128xbf16, #tpu.memory_space<vmem>>, %arg6: memref<1x128xf32, #tpu.memory_space<vmem>>, %arg7: memref<16x128xbf16, #tpu.memory_space<vmem>>, %arg8: memref<8x128xf32, #tpu.memory_space<vmem>>) attributes {dimension_semantics = [#tpu.dimension_semantics<parallel>], iteration_bounds = array<i64: 2>, scalar_prefetch = 0 : i64, scratch_operands = 0 : i64, tpu.core_type = #tpu.core_type<tc>, window_params = [{transform_indices = @transform_0, window_bounds = array<i64: 16, 32>}, {transform_indices = @transform_1, window_bounds = array<i64: 16, 1>}, {pipeline_mode = #tpu.pipeline_mode<synchronous>, transform_indices = @transform_2, window_bounds = array<i64: 32, 512>}, {pipeline_mode = #tpu.pipeline_mode<synchronous>, transform_indices = @transform_3, window_bounds = array<i64: 1, 512>}, {pipeline_mode = #tpu.pipeline_mode<synchronous>, transform_indices = @transform_4, window_bounds = array<i64: 512, 128>}, {pipeline_mode = #tpu.pipeline_mode<synchronous>, transform_indices = @transform_5, window_bounds = array<i64: 1, 128>}, {transform_indices = @transform_6, window_bounds = array<i64: 16, 128>}, {transform_indices = @transform_7, window_bounds = array<i64: 8, 128>}]} {
    %c0 = arith.constant 0 : index
    %c0_0 = arith.constant 0 : index
    %0 = vector.load %arg1[%c0, %c0_0] : memref<16x32xbf16, #tpu.memory_space<vmem>>, vector<16x32xbf16>
    %c0_1 = arith.constant 0 : index
    %c0_2 = arith.constant 0 : index
    %1 = vector.load %arg3[%c0_1, %c0_2] : memref<32x512xbf16, #tpu.memory_space<vmem>>, vector<32x512xbf16>
    %cst = arith.constant dense<0.000000e+00> : vector<16x512xf32>
    %2 = tpu.matmul %0, %1, %cst {dimension_numbers = #tpu.dot_dimension_numbers<[1], [0], [0], [1], [0, 0, 1, 1], [], []>} : vector<16x32xbf16>, vector<32x512xbf16>, vector<16x512xf32> -> vector<16x512xf32>
    %c0_3 = arith.constant 0 : index
    %c0_4 = arith.constant 0 : index
    %3 = vector.load %arg4[%c0_3, %c0_4] : memref<1x512xf32, #tpu.memory_space<vmem>>, vector<1x512xf32>
    %4 = vector.broadcast %3 : vector<1x512xf32> to vector<16x512xf32>
    %5 = arith.addf %2, %4 : vector<16x512xf32>
    %cst_5 = arith.constant 0.000000e+00 : f32
    %6 = vector.broadcast %cst_5 : f32 to vector<16x512xf32>
    %7 = arith.maximumf %5, %6 : vector<16x512xf32>
    %8 = arith.truncf %7 : vector<16x512xf32> to vector<16x512xbf16>
    %c0_6 = arith.constant 0 : index
    %c0_7 = arith.constant 0 : index
    %9 = vector.load %arg5[%c0_6, %c0_7] : memref<512x128xbf16, #tpu.memory_space<vmem>>, vector<512x128xbf16>
    %cst_8 = arith.constant dense<0.000000e+00> : vector<16x128xf32>
    %10 = tpu.matmul %8, %9, %cst_8 {dimension_numbers = #tpu.dot_dimension_numbers<[1], [0], [0], [1], [0, 0, 1, 1], [], []>} : vector<16x512xbf16>, vector<512x128xbf16>, vector<16x128xf32> -> vector<16x128xf32>
    %c0_9 = arith.constant 0 : index
    %c0_10 = arith.constant 0 : index
    %11 = vector.load %arg6[%c0_9, %c0_10] : memref<1x128xf32, #tpu.memory_space<vmem>>, vector<1x128xf32>
    %12 = vector.broadcast %11 : vector<1x128xf32> to vector<16x128xf32>
    %13 = arith.addf %10, %12 : vector<16x128xf32>
    %14 = arith.truncf %13 : vector<16x128xf32> to vector<16x128xbf16>
    %c0_11 = arith.constant 0 : index
    %c0_12 = arith.constant 0 : index
    %15 = vector.load %arg7[%c0_11, %c0_12] : memref<16x128xbf16, #tpu.memory_space<vmem>>, vector<16x128xbf16>
    tpu.vector_store %arg7[%c0_11, %c0_12], %14 {strides = array<i32>} : memref<16x128xbf16, #tpu.memory_space<vmem>>, vector<16x128xbf16>,
    %c0_13 = arith.constant 0 : index
    %c0_14 = arith.constant 0 : index
    %16 = vector.load %arg2[%c0_13, %c0_14] : memref<16x1xi32, #tpu.memory_space<vmem>>, vector<16x1xi32>
    %17 = tpu.iota {dimensions = array<i32: 1>} : vector<16x128xi32>
    %c2_i32 = arith.constant 2 : i32
    %18 = vector.broadcast %c2_i32 : i32 to vector<16x128xi32>
    %19 = arith.cmpi slt, %17, %18 : vector<16x128xi32>
    %cst_15 = arith.constant -1.000000e+30 : f32
    %20 = vector.broadcast %cst_15 : f32 to vector<16x128xf32>
    %21 = arith.select %19, %13, %20 : vector<16x128xi1>, vector<16x128xf32>
    %cst_16 = arith.constant dense<0xFF800000> : vector<16xf32>
    %22 = vector.multi_reduction <maximumf>, %21, %cst_16 [1] : vector<16x128xf32> to vector<16xf32>
    %23 = vector.shape_cast %22 : vector<16xf32> to vector<16x1xf32>
    %24 = vector.broadcast %23 : vector<16x1xf32> to vector<16x128xf32>
    %25 = arith.subf %21, %24 : vector<16x128xf32>
    %26 = math.exp %25 : vector<16x128xf32>
    %cst_17 = arith.constant dense<0.000000e+00> : vector<16xf32>
    %27 = vector.multi_reduction <add>, %26, %cst_17 [1] : vector<16x128xf32> to vector<16xf32>
    %28 = vector.shape_cast %27 : vector<16xf32> to vector<16x1xf32>
    %29 = math.log %28 : vector<16x1xf32>
    %30 = arith.addf %23, %29 : vector<16x1xf32>
    %31 = vector.broadcast %16 : vector<16x1xi32> to vector<16x128xi32>
    %32 = arith.cmpi eq, %17, %31 : vector<16x128xi32>
    %33 = arith.extui %32 : vector<16x128xi1> to vector<16x128xi32>
    %34 = arith.sitofp %33 : vector<16x128xi32> to vector<16x128xf32>
    %35 = arith.mulf %13, %34 : vector<16x128xf32>
    %cst_18 = arith.constant dense<0.000000e+00> : vector<16xf32>
    %36 = vector.multi_reduction <add>, %35, %cst_18 [1] : vector<16x128xf32> to vector<16xf32>
    %37 = vector.shape_cast %36 : vector<16xf32> to vector<16x1xf32>
    %c16_i32 = arith.constant 16 : i32
    %38 = arith.muli %arg0, %c16_i32 : i32
    %39 = tpu.iota {dimensions = array<i32: 0>} : vector<16x1xi32>
    %40 = vector.broadcast %38 : i32 to vector<16x1xi32>
    %41 = arith.addi %40, %39 : vector<16x1xi32>
    %c-100_i32 = arith.constant -100 : i32
    %42 = vector.broadcast %c-100_i32 : i32 to vector<16x1xi32>
    %43 = arith.cmpi ne, %16, %42 : vector<16x1xi32>
    %c32_i32 = arith.constant 32 : i32
    %44 = vector.broadcast %c32_i32 : i32 to vector<16x1xi32>
    %45 = arith.cmpi slt, %41, %44 : vector<16x1xi32>
    %46 = arith.andi %43, %45 : vector<16x1xi1>
    %47 = arith.subf %30, %37 : vector<16x1xf32>
    %cst_19 = arith.constant 0.000000e+00 : f32
    %48 = vector.broadcast %cst_19 : f32 to vector<16x1xf32>
    %49 = arith.select %46, %47, %48 : vector<16x1xi1>, vector<16x1xf32>
    %cst_20 = arith.constant dense<0.000000e+00> : vector<1xf32>
    %50 = vector.multi_reduction <add>, %49, %cst_20 [0] : vector<16x1xf32> to vector<1xf32>
    %51 = vector.shape_cast %50 : vector<1xf32> to vector<1x1xf32>
    %cst_21 = arith.constant 1.000000e+00 : f32
    %cst_22 = arith.constant 0.000000e+00 : f32
    %52 = vector.broadcast %cst_21 : f32 to vector<16x1xf32>
    %53 = vector.broadcast %cst_22 : f32 to vector<16x1xf32>
    %54 = arith.select %46, %52, %53 : vector<16x1xi1>, vector<16x1xf32>
    %cst_23 = arith.constant dense<0.000000e+00> : vector<1xf32>
    %55 = vector.multi_reduction <add>, %54, %cst_23 [0] : vector<16x1xf32> to vector<1xf32>
    %56 = vector.shape_cast %55 : vector<1xf32> to vector<1x1xf32>
    %57 = tpu.iota {dimensions = array<i32: 0>} : vector<8x128xi32>
    %58 = tpu.iota {dimensions = array<i32: 1>} : vector<8x128xi32>
    %c0_i32 = arith.constant 0 : i32
    %59 = vector.broadcast %c0_i32 : i32 to vector<8x128xi32>
    %60 = arith.cmpi eq, %57, %59 : vector<8x128xi32>
    %c0_i32_24 = arith.constant 0 : i32
    %61 = vector.broadcast %c0_i32_24 : i32 to vector<8x128xi32>
    %62 = arith.cmpi eq, %58, %61 : vector<8x128xi32>
    %63 = arith.andi %60, %62 : vector<8x128xi1>
    %cst_25 = arith.constant 0.000000e+00 : f32
    %64 = vector.shape_cast %51 : vector<1x1xf32> to vector<1x1xf32>
    %65 = vector.broadcast %64 : vector<1x1xf32> to vector<8x128xf32>
    %66 = vector.broadcast %cst_25 : f32 to vector<8x128xf32>
    %67 = arith.select %63, %65, %66 : vector<8x128xi1>, vector<8x128xf32>
    %c0_i32_26 = arith.constant 0 : i32
    %68 = vector.broadcast %c0_i32_26 : i32 to vector<8x128xi32>
    %69 = arith.cmpi eq, %57, %68 : vector<8x128xi32>
    %c1_i32 = arith.constant 1 : i32
    %70 = vector.broadcast %c1_i32 : i32 to vector<8x128xi32>
    %71 = arith.cmpi eq, %58, %70 : vector<8x128xi32>
    %72 = arith.andi %69, %71 : vector<8x128xi1>
    %cst_27 = arith.constant 0.000000e+00 : f32
    %73 = vector.shape_cast %56 : vector<1x1xf32> to vector<1x1xf32>
    %74 = vector.broadcast %73 : vector<1x1xf32> to vector<8x128xf32>
    %75 = vector.broadcast %cst_27 : f32 to vector<8x128xf32>
    %76 = arith.select %72, %74, %75 : vector<8x128xi1>, vector<8x128xf32>
    %77 = arith.addf %67, %76 : vector<8x128xf32>
    %c0_28 = arith.constant 0 : index
    %c0_29 = arith.constant 0 : index
    %78 = vector.load %arg8[%c0_28, %c0_29] : memref<8x128xf32, #tpu.memory_space<vmem>>, vector<8x128xf32>
    tpu.vector_store %arg8[%c0_28, %c0_29], %77 {strides = array<i32>} : memref<8x128xf32, #tpu.memory_space<vmem>>, vector<8x128xf32>,
    return
  }
  func.func @transform_0(%arg0: i32) -> (i32, i32) {
    %c0_i32 = arith.constant 0 : i32
    %c0_i32_0 = arith.constant 0 : i32
    return %arg0, %c0_i32 : i32, i32
  }
  func.func @transform_1(%arg0: i32) -> (i32, i32) {
    %c0_i32 = arith.constant 0 : i32
    %c0_i32_0 = arith.constant 0 : i32
    return %arg0, %c0_i32 : i32, i32
  }
  func.func @transform_2(%arg0: i32) -> (i32, i32) {
    %c0_i32 = arith.constant 0 : i32
    %c0_i32_0 = arith.constant 0 : i32
    %c0_i32_1 = arith.constant 0 : i32
    return %c0_i32, %c0_i32_0 : i32, i32
  }
  func.func @transform_3(%arg0: i32) -> (i32, i32) {
    %c0_i32 = arith.constant 0 : i32
    %c0_i32_0 = arith.constant 0 : i32
    %c0_i32_1 = arith.constant 0 : i32
    return %c0_i32, %c0_i32_0 : i32, i32
  }
  func.func @transform_4(%arg0: i32) -> (i32, i32) {
    %c0_i32 = arith.constant 0 : i32
    %c0_i32_0 = arith.constant 0 : i32
    %c0_i32_1 = arith.constant 0 : i32
    return %c0_i32, %c0_i32_0 : i32, i32
  }
  func.func @transform_5(%arg0: i32) -> (i32, i32) {
    %c0_i32 = arith.constant 0 : i32
    %c0_i32_0 = arith.constant 0 : i32
    %c0_i32_1 = arith.constant 0 : i32
    return %c0_i32, %c0_i32_0 : i32, i32
  }
  func.func @transform_6(%arg0: i32) -> (i32, i32) {
    %c0_i32 = arith.constant 0 : i32
    %c0_i32_0 = arith.constant 0 : i32
    return %arg0, %c0_i32 : i32, i32
  }
  func.func @transform_7(%arg0: i32) -> (i32, i32) {
    %c0_i32 = arith.constant 0 : i32
    %c0_i32_0 = arith.constant 0 : i32
    return %arg0, %c0_i32 : i32, i32
  }
}

</mosaic_0001>

<bundles_post_ra>
// kernel: lcplm_forward.1
= control target key start
LH: loop header
LB: loop body
LE: loop exit
PB: predicated region body
PF: predicated region fallthrough
CT: control target
= control target key end

     0   :  { %13 = vsyncpa [#allocation3], 0  ;;  %s1355_s24 = smov 0   ;;  %s1484_s0 = inlined_call_operand.vmem [shape: bf16[32,32], index: 0, kind: input, shape index: {}]   ;;  %s1485_s1 = inlined_call_operand.vmem [shape: s32[32,1], index: 1, kind: input, shape index: {}]   ;;  %s1486_s2 = inlined_call_operand.vmem [shape: bf16[32,512], index: 2, kind: input, shape index: {}]   ;;  %s1487_s3 = inlined_call_operand.vmem [shape: f32[1,512], index: 3, kind: input, shape index: {}]   ;;  %s1488_s4 = inlined_call_operand.hbm [shape: bf16[512,128], index: 4, kind: input, shape index: {}]   ;;  %s1489_s5 = inlined_call_operand.vmem [shape: f32[1,128], index: 5, kind: input, shape index: {}]   ;;  %s1490_s6 = inlined_call_operand.vmem [shape: bf16[32,128], index: 6, kind: output, shape index: {0}]   ;;  %s1491_s7 = inlined_call_operand.vmem [shape: f32[16,128], index: 7, kind: output, shape index: {1}]  }
   0x1 LB: > { %s1361_s25 = sadd.s32 4294967295, %s1308_s24   ;;  %p1080_p0 = scmp.ge.s32.totalorder %s1308_s24, 1  ;;  %s1308_s24 = sphi %s1355_s24, %s19_s24  }
   0x2   : > { %p212_p1 = scmp.lt.s32.totalorder %s1308_s24, 3  ;;  %s1310_s26 = smov [#allocation2]  }
   0x3   : > { %s230_s27 = sshll.u32 %s1310_s26, 4  ;;  %p1202_p3 = scmp.eq.s32.totalorder %s1361_s25, 0  ;;  %s231_s27 = int_to_ptr.vmem [resolvable:$true] %s230_s27 }
   0x4   : > { %p1365_p2 = pnand %p1080_p0, %p212_p1  ;;  %s1283_s29 = scalar_lea.vmem %s231_s27, 4096 }
   0x5   : > { %p1284_p7 = scmp.ne.s32.totalorder %s231_s27, %s1283_s29  ;;  %p1291_p10 = scmp.lt.s32.totalorder %s231_s27, %s231_s27 }
   0x6   : > { %p1198_p4 = pneg %p1365_p2  ;;  %p1292_p11 = scmp.lt.s32.totalorder %s1283_s29, %s1283_s29 }
   0x8   : > { %p1199_p5 = pnand %p1202_p3, %p1198_p4  ;;  %p1293_p12 = por %p1292_p11, %p1291_p10 }
   0xa   : > { %p1274_p6 = pneg %p1199_p5 }
   0xc   : > { %p1286_p8 = pnand %p1284_p7, %p1274_p6 }
   0xe   : > { %p1287_p9 = pneg %p1286_p8 }
  0x10   : > { %p1294_p13 = pnand %p1293_p12, %p1287_p9 }
  0x12   : > { %1297 = shalt.err (!%p1294_p13)
}
  0x13   : > { %s1311_s30 = smov 64   ;;  %s1312_s8 = smov 4  }
  0x14   : > { %1201 = dma.hbm_to_vmem [thread:$0]  (!%p1199_p5), %s1488_s4, 4096, %s231_s27, [#allocation3], %s1311_s30, %s1311_s30, %s1312_s8  }
  0x15   : > { %267 = sbr.rel (%p1365_p2) target bundleno = 908 (0x38c), region = 44 }
  0x1a   : > { %1303 = dma.done.wait (%p1202_p3), [#allocation3], 4096  }
  0x1b   : > { %1305 = vsyncadd (%p1202_p3), [#allocation3], 4294963200  ;;  %s1085_s11 = sshll.u32 %s1361_s25, 1  ;;  %v1313_v0 = vmov 0   ;;  %v1219_v1 = vld [vmem:[%s1486_s2 + $0x24] ss:$16 sps:$4 sm:$0xff]   ;;  %v343_v44 = vlaneseq }
  0x1c   : > { %444 = vmatprep.mubr.bf16.mxu0 %v1313_v0  ;;  %487 = vmatprep.mubr.bf16.mxu1 %v1313_v0  ;;  %p309_p0 = scmp.lt.s32.totalorder %s1085_s11, 3  ;;  %v1221_v2 = vld [vmem:[%s1486_s2 + $0x2c] ss:$16 sps:$4 sm:$0xff]   ;;  %v1223_v3 = vld [vmem:[%s1486_s2 + $0x20] ss:$16 sps:$4 sm:$0xff]   ;;  %vm408_vm0 = vcmask 261120  }
  0x1d   : > { %1217 = vset.pattern.permute.xlu1 %v1313_v0  ;;  %1218 = vset.pattern.permute.xlu0 %v1313_v0  ;;  %v1224_v4 = vld [vmem:[%s1486_s2 + $0x28] ss:$16 sps:$4 sm:$0xff]   ;;  %v1225_v5 = vld [vmem:[%s1486_s2 + $0x4] ss:$16 sps:$4 sm:$0xff]   ;;  %v1227_v6 = vld [vmem:[%s1486_s2 + $0xc] ss:$16 sps:$4 sm:$0xff]  }
  0x1e   : > { %s1498_s11 = smov (!%p309_p0, %s1085_s11), 3  ;;  %424 = vmatprep.subr.bf16.mxu0 %v1219_v1  ;;  %467 = vmatprep.subr.bf16.mxu1 %v1221_v2  ;;  %v1229_v7 = vld [vmem:[%s1486_s2] ss:$16 sps:$4 sm:$0xff]   ;;  %v1230_v8 = vld [vmem:[%s1486_s2 + $0x8] ss:$16 sps:$4 sm:$0xff]   ;;  %v1426_v45 = vshrl.u32 %v343_v44, 7 }
  0x1f   : > { %s1086_s14 = sshll.u32 %s1498_s11, 2  ;;  %425 = vmatpush1.bf16.msra.mxu0 %v1223_v3  ;;  %468 = vmatpush1.bf16.msra.mxu1 %v1224_v4  ;;  %v1232_v10 = vld [vmem:[#allocation2 + $0x78] sm:$0xff]   ;;  %v1236_v14 = vld [vmem:[#allocation2 + $0x70] sm:$0xff]   ;;  %v1240_v18 = vld [vmem:[#allocation2 + $0x68] sm:$0xff]   ;;  %s1088_s12 = sshll.u32 %s1498_s11, 3  ;;  %vm927_vm8 = vcmask 7168  }
  0x20   : > { %s312_s27 = scalar_lea.vmem %s1484_s0, %s1086_s14  ;;  %426 = vmatprep.subr.bf16.mxu0 %v1225_v5  ;;  %469 = vmatprep.subr.bf16.mxu1 %v1227_v6  ;;  %v1233_v11 = vld [vmem:[#allocation2 + $0xf8] sm:$0xff]   ;;  %v1237_v15 = vld [vmem:[#allocation2 + $0xf0] sm:$0xff]   ;;  %v1241_v19 = vld [vmem:[#allocation2 + $0xe8] sm:$0xff]   ;;  %s318_s16 = scalar_lea.vmem %s1485_s1, %s1088_s12  ;;  %v349_v46 = vsub.s32 1, %v1426_v45  ;;  %v357_v47 = vsub.s32 3, %v1426_v45  ;;  %v345_v48 = vsub.s32 0, %v1426_v45 }
  0x21   : > { %v1231_v9 = vld [vmem:[%s312_s27] sm:$0xff]   ;;  %v1234_v12 = vld [vmem:[#allocation2 + $0x38] sm:$0xff]   ;;  %v1238_v16 = vld [vmem:[#allocation2 + $0x30] sm:$0xff]   ;;  %v353_v49 = vsub.s32 2, %v1426_v45  ;;  %s324_s23 = scalar_lea.vmem %s1490_s6, %s1086_s14  ;;  %s1140_s26 = sshll.u32 %s1361_s25, 4  ;;  %vm948_vm11 = vcmp.eq.s32.totalorder %v1426_v45, 0 }
  0x22   : > { %v1235_v13 = vld [vmem:[#allocation2 + $0xb8] sm:$0xff]   ;;  %v1239_v17 = vld [vmem:[#allocation2 + $0xb0] sm:$0xff]   ;;  %v1242_v20 = vld [vmem:[#allocation2 + $0x28] sm:$0xff]   ;;  %p326_p1 = scmp.lt.s32.totalorder %s1361_s25, 1 }
  0x23   : > { %427 = vmatpush1.bf16.msra.mxu0 %v1229_v7  ;;  %470 = vmatpush1.bf16.msra.mxu1 %v1230_v8  ;;  %v1243_v21 = vld [vmem:[#allocation2 + $0xa8] sm:$0xff]   ;;  %v1244_v22 = vld [vmem:[#allocation2 + $0x60] sm:$0xff]   ;;  %v1248_v26 = vld [vmem:[#allocation2 + $0x58] sm:$0xff]  }
  0x24   : > { %1150 = vmatprep.subr.bf16.mxu0 %v1232_v10  ;;  %1172 = vmatprep.subr.bf16.mxu1 %v1233_v11  ;;  %v1245_v23 = vld [vmem:[#allocation2 + $0xe0] sm:$0xff]   ;;  %v1249_v27 = vld [vmem:[#allocation2 + $0xd8] sm:$0xff]   ;;  %v1252_v30 = vld [vmem:[#allocation2 + $0x50] sm:$0xff]   ;;  %s1500_s25 = smov (!%p326_p1, %s1361_s25), 1 }
  0x25   : > { %v1246_v24 = vld [vmem:[#allocation2 + $0x20] sm:$0xff]   ;;  %v1250_v28 = vld [vmem:[#allocation2 + $0x18] sm:$0xff]   ;;  %v1253_v31 = vld [vmem:[#allocation2 + $0xd0] sm:$0xff]   ;;  %s1091_s11 = sshll.u32 %s1500_s25, 3 }
  0x26   : > { %1101 = vmatmul.mubr.msk.bf16.vlgmr.msra.gmra.mxu0 %vm408_vm0, %v1231_v9  ;;  %1102 = vmatmul.mubr.msk.bf16.vlgmr.msra.gmra.mxu1 %vm408_vm0, %v1231_v9  ;;  %v1247_v25 = vld [vmem:[#allocation2 + $0xa0] sm:$0xff]   ;;  %v1251_v29 = vld [vmem:[#allocation2 + $0x98] sm:$0xff]   ;;  %v1254_v32 = vld [vmem:[#allocation2 + $0x10] sm:$0xff]   ;;  %s329_s28 = scalar_lea.vmem %s1491_s7, %s1091_s11 }
  0x27   : > { %1151 = vmatpush3.bf16.msra.mxu0 %v1234_v12  ;;  %1173 = vmatpush3.bf16.msra.mxu1 %v1235_v13  ;;  %v1255_v33 = vld [vmem:[#allocation2 + $0x90] sm:$0xff]   ;;  %v1256_v34 = vld [vmem:[#allocation2 + $0x48] sm:$0xff]   ;;  %v1260_v38 = vld [vmem:[#allocation2 + $0x40] sm:$0xff]  }
  0x28   : > { %1152 = vmatprep.subr.bf16.mxu0 %v1236_v14  ;;  %1174 = vmatprep.subr.bf16.mxu1 %v1237_v15  ;;  %v1257_v35 = vld [vmem:[#allocation2 + $0xc8] sm:$0xff]   ;;  %v1261_v39 = vld [vmem:[#allocation2 + $0xc0] sm:$0xff]  }
  0x29   : > { %v1258_v36 = vld [vmem:[#allocation2 + $0x8] sm:$0xff]   ;;  %v1262_v40 = vld [vmem:[#allocation2] sm:$0xff]  }
  0x2a   : > { %v1259_v37 = vld [vmem:[#allocation2 + $0x88] sm:$0xff]   ;;  %v1263_v41 = vld [vmem:[#allocation2 + $0x80] sm:$0xff]  }
  0x2b   : > { %1153 = vmatpush3.bf16.msra.mxu0 %v1238_v16  ;;  %1175 = vmatpush3.bf16.msra.mxu1 %v1239_v17  ;;  %v1420_v42 = vld [vmem:[%s318_s16] sm:$0xff]  ;;  %v1423_v43 = vld [vmem:[%s318_s16 + $0x8] sm:$0xff] }
  0x2c   : > { %1154 = vmatprep.subr.bf16.mxu0 %v1240_v18  ;;  %1176 = vmatprep.subr.bf16.mxu1 %v1241_v19  ;;  %v341_v50 = vld [vmem:[%s1487_s3] sm:$0xf]  ;;  %vm917_vm3 = vcmp.ne.s32.totalorder %v1420_v42, 4294967196  ;;  %vm918_vm4 = vcmp.ne.s32.totalorder %v1423_v43, 4294967196 }
  0x2d   : > { %893 = vperm.xlu1 %1217, %v1420_v42   ;;  %v350_v53 = vrot.slane %v341_v50, %v349_v46  ;;  %v358_v54 = vrot.slane %v341_v50, %v357_v47  ;;  %v346_v55 = vrot.slane %v341_v50, %v345_v48  ;;  %v354_v56 = vrot.slane %v341_v50, %v353_v49 }
  0x2f   : > { %1155 = vmatpush3.bf16.msra.mxu0 %v1242_v20  ;;  %1177 = vmatpush3.bf16.msra.mxu1 %v1243_v21  ;;  %v1103_v21 = vld [vmem:[%s1489_s5] ss:$0 sm:$0xff] }
  0x30   : > { %1156 = vmatprep.subr.bf16.mxu0 %v1244_v22  ;;  %1178 = vmatprep.subr.bf16.mxu1 %v1245_v23 }
  0x31   : > { %896 = vperm.xlu1 %1217, %v1423_v43  }
  0x33   : > { %1157 = vmatpush3.bf16.msra.mxu0 %v1246_v24  ;;  %1179 = vmatpush3.bf16.msra.mxu1 %v1247_v25  ;;  %v1438_v24 = vand.u32 127, %v343_v44 }
  0x34   : > { %1158 = vmatprep.subr.bf16.mxu0 %v1248_v26  ;;  %1180 = vmatprep.subr.bf16.mxu1 %v1249_v27 }
  0x35   : > { %vm869_vm1 = vcmp.lt.s32.totalorder %v1438_v24, 2  ;;  %vm957_vm12 = vcmp.eq.s32.totalorder %v1438_v24, 1  ;;  %vm949_vm13 = vcmp.eq.s32.totalorder %v1438_v24, 0 }
  0x36   : > { %vm958_vm14 = vmand %vm948_vm11, %vm957_vm12 }
  0x37   : > { %1159 = vmatpush3.bf16.msra.mxu0 %v1250_v28  ;;  %1181 = vmatpush3.bf16.msra.mxu1 %v1251_v29  ;;  %vm950_vm15 = vmand %vm948_vm11, %vm949_vm13 }
  0x38   : > { %1160 = vmatprep.subr.bf16.mxu0 %v1252_v30  ;;  %1182 = vmatprep.subr.bf16.mxu1 %v1253_v31 }
  0x3b   : > { %1161 = vmatpush3.bf16.msra.mxu0 %v1254_v32  ;;  %1183 = vmatpush3.bf16.msra.mxu1 %v1255_v33 }
  0x3c   : > { %1162 = vmatprep.subr.bf16.mxu0 %v1256_v34  ;;  %1184 = vmatprep.subr.bf16.mxu1 %v1257_v35 }
  0x3f   : > { %1163 = vmatpush3.bf16.msra.mxu0 %v1258_v36  ;;  %1185 = vmatpush3.bf16.msra.mxu1 %v1259_v37 }
  0x40   : > { %1164 = vmatprep.subr.bf16.mxu0 %v1260_v38  ;;  %1186 = vmatprep.subr.bf16.mxu1 %v1261_v39 }
  0x43   : > { %1165 = vmatpush3.bf16.msra.mxu0 %v1262_v40  ;;  %1187 = vmatpush3.bf16.msra.mxu1 %v1263_v41  ;;  %v914_v40 = vstv %s1140_s26  ;;  %v913_v41 = vadd.s32 8, %v1426_v45 }
  0x44   : > { %v915_v44 = vadd.s32 %v914_v40, %v1426_v45 }
  0x45   : > { %v916_v46 = vadd.s32 %v914_v40, %v913_v41 }
  0x46   : > { %vm919_vm2 = vcmp.lt.s32.totalorder %v915_v44, 32 }
  0x47   : > { %vm920_vm5 = vcmp.lt.s32.totalorder %v916_v46, 32  ;;  %vm1451_vm6 = vmand %vm917_vm3, %vm919_vm2 }
  0x48   : > { %vm1455_vm7 = vmand %vm918_vm4, %vm920_vm5 }
  0xe6   : > { %v446_v51 = vpop.f32.mrf.mxu0  ;;  %v489_v52 = vpop.f32.mrf.mxu1 }
  0xe7   : > { %v447_v1 = vadd.f32 %v446_v51, %v346_v55  ;;  %v490_v2 = vadd.f32 %v489_v52, %v354_v56 }
  0xe8   : > { %v448_v57 = vpop.f32.mrf.mxu0  ;;  %v491_v58 = vpop.f32.mrf.mxu1 }
  0xe9   : > { %v449_v61 = vadd.f32 %v448_v57, %v350_v53  ;;  %v492_v62 = vadd.f32 %v491_v58, %v358_v54  ;;  %v498_v13 = vmax.f32 %v447_v1, 0.0  ;;  %v500_v14 = vmax.f32 %v490_v2, 0.0  ;;  %v894_v58 = vpop.permute.xlu1 %893 }
  0xea   : > { %v450_v59 = vpop.f32.mrf.mxu0  ;;  %v493_v60 = vpop.f32.mrf.mxu1  ;;  %vm898_vm9 = vcmp.eq.s32.totalorder %v1438_v24, %v894_v58 }
  0xeb   : > { %v451_v63 = vadd.f32 %v450_v59, %v346_v55  ;;  %v494_v0 = vadd.f32 %v493_v60, %v354_v56  ;;  %v499_v9 = vmax.f32 %v449_v61, 0.0  ;;  %v501_v10 = vmax.f32 %v492_v62, 0.0 }
  0xec   : > { %v452_v3 = vpop.f32.mrf.mxu0  ;;  %v495_v4 = vpop.f32.mrf.mxu1 }
  0xed   : > { %v453_v5 = vadd.f32 %v452_v3, %v350_v53  ;;  %v496_v6 = vadd.f32 %v495_v4, %v358_v54  ;;  %v502_v7 = vmax.f32 %v451_v63, 0.0  ;;  %v504_v8 = vmax.f32 %v494_v0, 0.0  ;;  %v897_v61 = vpop.permute.xlu1 %896 }
  0xee   : > { %v1314_v54 = vmov 0.0   ;;  %vm899_vm10 = vcmp.eq.s32.totalorder %v1438_v24, %v897_v61 }
  0xef   : > { %v503_v11 = vmax.f32 %v453_v5, 0.0  ;;  %v505_v12 = vmax.f32 %v496_v6, 0.0  ;;  %v506_v17 = vpack.c.bf16 %v502_v7, %v498_v13  ;;  %v508_v18 = vpack.c.bf16 %v504_v8, %v500_v14 }
  0xf0   : > { %v937_v42 = vsel %vm1451_vm6, 1.0, %v1314_v54  ;;  %v938_v43 = vsel %vm1455_vm7, 1.0, %v1314_v54  ;;  %v1138_v63 = vsel %vm898_vm9, 1.0, %v1314_v54  ;;  %v1139_v3 = vsel %vm899_vm10, 1.0, %v1314_v54 }
  0xf1   : > { %v507_v15 = vpack.c.bf16 %v503_v11, %v499_v9  ;;  %v509_v16 = vpack.c.bf16 %v505_v12, %v501_v10  ;;  %v939_v56 = vsel %vm927_vm8, %v937_v42, 0.0  ;;  %v940_v57 = vsel %vm927_vm8, %v938_v43, 0.0 }
  0xf2   : > { %v941_v59 = vadd.f32 %v940_v57, %v939_v56 }
  0xf3   : > { %805 = vmatprep.mubr.bf16.mxu0 %v507_v15  ;;  %846 = vmatprep.mubr.bf16.mxu1 %v509_v16 }
  0xf4   : > { %806 = vmatmul.mubr.bf16.vlgmr.msra.gmra.mxu0 %v506_v17  ;;  %847 = vmatmul.mubr.bf16.vlgmr.msra.gmra.mxu1 %v508_v18  ;;  %v942_v60 = vrot.slane %v941_v59, 4 }
  0xf6   : > { %v943_v0 = vadd.f32 %v942_v60, %v941_v59 }
  0xf8   : > { %v944_v4 = vrot.slane %v943_v0, 2 }
  0xfa   : > { %v945_v6 = vadd.f32 %v944_v4, %v943_v0 }
  0xfc   : > { %v946_v7 = vrot.slane %v945_v6, 1 }
  0xfe   : > { %v947_v8 = vadd.f32 %v946_v7, %v945_v6 }
 0x1b4   : > { %v1166_v19 = vpop.f32.mrf.mxu0  ;;  %v1188_v20 = vpop.f32.mrf.mxu1 }
 0x1b6   : > { %v1167_v22 = vpop.f32.mrf.mxu0  ;;  %v1189_v23 = vpop.f32.mrf.mxu1 }
 0x1b7   : > { %v1168_v25 = vadd.f32 %v1167_v22, %v1166_v19  ;;  %v1190_v29 = vadd.f32 %v1189_v23, %v1188_v20 }
 0x1b8   : > { %v1169_v26 = vpop.f32.mrf.mxu0  ;;  %v1191_v27 = vpop.f32.mrf.mxu1 }
 0x1b9   : > { %v808_v28 = vadd.f32 %v1168_v25, %v1103_v21 }
 0x1ba   : > { %v1170_v30 = vpop.f32.mrf.mxu0  ;;  %v1192_v31 = vpop.f32.mrf.mxu1 }
 0x1bb   : > { %v849_v32 = vadd.f32 %v1190_v29, %v808_v28  ;;  %v1171_v33 = vadd.f32 %v1170_v30, %v1169_v26  ;;  %v1193_v35 = vadd.f32 %v1192_v31, %v1191_v27 }
 0x1bd   : > { %v811_v34 = vadd.f32 %v1171_v33, %v1103_v21  ;;  %v870_v36 = vsel %vm869_vm1, %v849_v32, -1e+30  ;;  %v904_v1 = vmul.f32 %v1138_v63, %v849_v32 }
 0x1be   : > { %872 = vmax.xlane.f32.xlu0 %v870_v36 }
 0x1bf   : > { %v852_v37 = vadd.f32 %v1193_v35, %v811_v34 }
 0x1c1   : > { %v1148_v38 = vpack.c.bf16 %v852_v37, %v849_v32  ;;  %v871_v39 = vsel %vm869_vm1, %v852_v37, -1e+30  ;;  %v905_v5 = vmul.f32 %v1139_v3, %v852_v37 }
 0x1c2   : > { %874 = vmax.xlane.f32.xlu0 %v871_v39 }
 0x1c3   : > { %1149 = vst [vmem:[%s324_s23] sm:$0xff] %v1148_v38  }
 0x247   : > { %v873_v47 = vpop.xlane.xlu0 %872 }
 0x248   : > { %v876_v48 = vsub.f32 %v870_v36, %v873_v47 }
 0x24a   : > { %v878_v51 = vmul.f32 1.442695, %v876_v48 }
 0x24b   : > { %v875_v52 = vpop.xlane.xlu0 %874 }
 0x24c   : > { %1264 = vpow2.f32 %v878_v51  ;;  %v877_v53 = vsub.f32 %v871_v39, %v875_v52 }
 0x24e   : > { %v880_v55 = vmul.f32 1.442695, %v877_v53 }
 0x250   : > { %1266 = vpow2.f32 %v880_v55 }
 0x259   : > { %v1265_v62 = vpop.eup %1264 }
 0x25a   : > { %882 = vadd.xlane.f32.xlu0 %v1265_v62 }
 0x25d   : > { %v1267_v2 = vpop.eup %1266 }
 0x25e   : > { %906 = vadd.xlane.f32.xlu0 %v904_v1  ;;  %884 = vadd.xlane.f32.xlu1 %v1267_v2 }
 0x262   : > { %908 = vadd.xlane.f32.xlu0 %v905_v5 }
 0x26f   : > { %961 = vperm.xlu1 %1217, %v947_v8  }
 0x2e3   : > { %v883_v9 = vpop.xlane.xlu0 %882 }
 0x2e4   : > { %1268 = vlog2.f32 %v883_v9 }
 0x2e7   : > { %v885_v10 = vpop.xlane.xlu1 %884  ;;  %v907_v13 = vpop.xlane.xlu0 %906 }
 0x2e8   : > { %1270 = vlog2.f32 %v885_v10 }
 0x2eb   : > { %v909_v19 = vpop.xlane.xlu0 %908  ;;  %v962_v33 = vpop.permute.xlu1 %961 }
 0x2ec   : > { %v964_v35 = vsel %vm958_vm14, %v962_v33, 0.0 }
 0x2f1   : > { %v1269_v11 = vpop.eup %1268 }
 0x2f2   : > { %v887_v12 = vmul.f32 0.6931472, %v1269_v11 }
 0x2f4   : > { %v890_v14 = vadd.f32 %v887_v12, %v873_v47 }
 0x2f5   : > { %v1271_v15 = vpop.eup %1270 }
 0x2f6   : > { %v889_v16 = vmul.f32 0.6931472, %v1271_v15  ;;  %v923_v17 = vsub.f32 %v890_v14, %v907_v13 }
 0x2f8   : > { %v891_v18 = vadd.f32 %v889_v16, %v875_v52  ;;  %v925_v20 = vsel %vm1451_vm6, %v923_v17, 0.0 }
 0x2f9   : > { %v928_v23 = vsel %vm927_vm8, %v925_v20, 0.0 }
 0x2fa   : > { %v924_v21 = vsub.f32 %v891_v18, %v909_v19 }
 0x2fc   : > { %v926_v22 = vsel %vm1455_vm7, %v924_v21, 0.0 }
 0x2fd   : > { %v929_v25 = vsel %vm927_vm8, %v926_v22, 0.0 }
 0x2fe   : > { %v930_v26 = vadd.f32 %v929_v25, %v928_v23 }
 0x300   : > { %v931_v27 = vrot.slane %v930_v26, 4 }
 0x302   : > { %v932_v28 = vadd.f32 %v931_v27, %v930_v26 }
 0x304   : > { %v933_v29 = vrot.slane %v932_v28, 2 }
 0x306   : > { %v934_v30 = vadd.f32 %v933_v29, %v932_v28 }
 0x308   : > { %v935_v31 = vrot.slane %v934_v30, 1 }
 0x30a   : > { %v936_v32 = vadd.f32 %v935_v31, %v934_v30 }
 0x30c   : > { %953 = vperm.xlu0 %1218, %v936_v32  }
 0x387   : > { %v954_v34 = vpop.permute.xlu0 %953 }
 0x388   : > { %v956_v36 = vsel %vm950_vm15, %v954_v34, 0.0 }
 0x389   : > { %v965_v37 = vadd.f32 %v964_v35, %v956_v36 }
 0x38b   : > { %966 = vst [vmem:[%s329_s28] sm:$0xff] %v965_v37 }
 0x38c PF: > { %s19_s24 = sadd.s32 1, %s1308_s24  }
 0x38d   : > { %p16_p2 = scmp.ge.s32.totalorder %s19_s24, 4  }
 0x38f   :  { %18 = sbr.rel (!%p16_p2) target bundleno = 1 (0x1), region = 94 }
 0x394   :  { %1003 = vsyncpa [#allocation3], 1 }
 0x395   :  { %1005 = vsyncpa [#allocation3 + $0x1], 1 }

</bundles_post_ra>
